<compile_context>
chip_gen: v7x
topology: tpu7x:2x2x1
jax: 0.10.0
libtpu: 0.0.40
codegen_flags: <defaults>
</compile_context>

<pallas_src>
import functools

import jax
import jax.numpy as jnp
from jax import lax
from jax.experimental import pallas as pl
from jax.experimental.pallas import tpu as pltpu

LN_EPS = 1e-5


def _layernorm(x, w, b):
    mu = jnp.mean(x, axis=-1, keepdims=True)
    var = jnp.mean((x - mu) ** 2, axis=-1, keepdims=True)
    return (x - mu) * lax.rsqrt(var + LN_EPS) * w + b


def _gelu(x):
    # TODO(synk): mlp.MLP activation not provided; assumed GELU (tanh approx, EUP-friendly;
    # torch.nn.GELU default is the exact erf form).
    c = 0.7978845608028654  # sqrt(2/pi)
    return 0.5 * x * (1.0 + jnp.tanh(c * (x + 0.044715 * x * x * x)))


def _pick_tile(dim, target, align):
    """Largest tile <= target that divides dim and is `align`-aligned; else full extent."""
    if dim <= target:
        return dim
    for t in range(target, align - 1, -1):
        if dim % t == 0 and t % align == 0:
            return t
    return dim  # TODO(synk): awkward dims fall back to the full axis (VMEM blowup risk).


def _head_group(n_heads, target=8):
    """Heads processed per attention step: bounds the f32 (HG,TS,TS) score tensor."""
    for g in range(min(target, n_heads), 0, -1):
        if n_heads % g == 0:
            return g
    return 1


def _compiler_params(dims):
    # Explicit per-generation VMEM budget (v7x: 64 MiB physical vs 128 MiB on v5e/v6e).
    try:
        cap = pltpu.get_tpu_info().vmem_capacity_bytes
    except Exception:
        cap = 64 * 1024 * 1024
    return pltpu.CompilerParams(dimension_semantics=dims,
                                vmem_limit_bytes=int(cap * 3 // 4))


def _bf16_exp_ok():
    # bf16 EUP exists on v6e/v7x; keep f32 exp on v2-v5.
    try:
        kind = jax.devices()[0].device_kind.lower()
        return not any(v in kind for v in ("v2", "v3", "v4", "v5"))
    except Exception:
        return True


# ------------------------------ kernel 1: LN1 + fused QKV projection ------------------------------
def _qkv_kernel(x_ref, ln1w_ref, ln1b_ref, wqkv_ref, bqkv_ref, q_ref, k_ref, v_ref,
                *, n_heads, scale):
    E = x_ref.shape[2]
    dh = E // n_heads
    h = _layernorm(x_ref[0], ln1w_ref[...], ln1b_ref[...])                       # (TS,E) f32
    y = jnp.dot(h.astype(jnp.bfloat16), wqkv_ref[...],
                preferred_element_type=jnp.float32) + bqkv_ref[...]              # (TS,3E) f32
    q = y[:, :E] * scale
    k = y[:, E:2 * E]
    v = y[:, 2 * E:]
    # Head split once per T-tile (amortized; not inside the kv loop anymore).
    for hh in range(n_heads):
        sl = slice(hh * dh, (hh + 1) * dh)
        q_ref[0, hh] = q[:, sl].astype(q_ref.dtype)
        k_ref[0, hh] = k[:, sl].astype(k_ref.dtype)
        v_ref[0, hh] = v[:, sl].astype(v_ref.dtype)


def run_qkv(x, ln1w, ln1b, wqkv, bqkv, n_heads, seq_tile):
    B, T, E = x.shape
    TS = _pick_tile(T, seq_tile, 8)
    nq = T // TS
    dh = E // n_heads
    bf = jnp.bfloat16
    scale = 1.0 / float(dh) ** 0.5
    wqkv16 = wqkv.astype(bf)

    def wspec(a):
        nd = a.ndim
        return pl.BlockSpec(a.shape, lambda b, ti, _nd=nd: (0,) * _nd)

    hspec = pl.BlockSpec((1, n_heads, TS, dh), lambda b, ti: (b, 0, ti, 0))
    out_shape = jax.ShapeDtypeStruct((B, n_heads, T, dh), bf)
    kernel = functools.partial(_qkv_kernel, n_heads=n_heads, scale=scale)
    return pl.pallas_call(
        kernel,
        out_shape=(out_shape, out_shape, out_shape),
        grid=(B, nq),
        in_specs=[pl.BlockSpec((1, TS, E), lambda b, ti: (b, ti, 0)),
                  wspec(ln1w), wspec(ln1b), wspec(wqkv16), wspec(bqkv)],
        out_specs=(hspec, hspec, hspec),
        compiler_params=_compiler_params(("parallel", "parallel")),
    )(x, ln1w, ln1b, wqkv16, bqkv)


# --------------------------- kernel 2: flash attention (triangular grid) ---------------------------
def _attn_kernel(qi_tbl, ki_tbl, q_ref, k_ref, v_ref, o_ref, m_scr, l_scr, acc_scr,
                 *, ts, bf16_exp):
    s_idx = pl.program_id(2)
    qi = qi_tbl[s_idx]
    ki = ki_tbl[s_idx]

    @pl.when(ki == 0)
    def _init():
        m_scr[...] = jnp.full_like(m_scr, -jnp.inf)
        l_scr[...] = jnp.zeros_like(l_scr)
        acc_scr[...] = jnp.zeros_like(acc_scr)

    def attend(masked):
        # q pre-scaled bf16 (HG,TS,dh); batched over heads -> one MXU contraction.
        s = jnp.einsum('hqd,hkd->hqk', q_ref[0], k_ref[0],
                       preferred_element_type=jnp.float32)                        # (HG,TS,TS)
        if masked:  # only the diagonal tile pays for the causal mask
            qpos = lax.broadcasted_iota(jnp.int32, (1, ts, ts), 1)
            kpos = lax.broadcasted_iota(jnp.int32, (1, ts, ts), 2)
            s = jnp.where(qpos >= kpos, s, -jnp.inf)
        m_prev = m_scr[...]
        m_new = jnp.maximum(m_prev, jnp.max(s, axis=-1, keepdims=True))
        alpha = jnp.exp(m_prev - m_new)
        if bf16_exp:   # EUP throughput ~2x on v6e/v7x; masked (-inf) lanes still underflow to 0
            p = jnp.exp((s - m_new).astype(jnp.bfloat16))
        else:
            p = jnp.exp(s - m_new).astype(jnp.bfloat16)
        l_scr[...] = alpha * l_scr[...] + jnp.sum(p.astype(jnp.float32), axis=-1, keepdims=True)
        acc_scr[...] = alpha * acc_scr[...] + jnp.einsum(
            'hqk,hkd->hqd', p, v_ref[0], preferred_element_type=jnp.float32)
        m_scr[...] = m_new

    @pl.when(ki < qi)
    def _off_diag():
        attend(False)

    @pl.when(ki == qi)          # last contributing kv tile for this query tile
    def _diag_and_finalize():
        attend(True)
        inv_l = pl.reciprocal(l_scr[...], approx=True)     # deferred normalization on the EUP
        o_ref[0] = (acc_scr[...] * inv_l).astype(o_ref.dtype)


def run_attention(q, k, v, seq_tile):
    B, H, T, dh = q.shape
    TS = _pick_tile(T, seq_tile, 8)
    nq = T // TS
    HG = _head_group(H)
    n_hg = H // HG

    # Triangular step -> (qi, ki) tables (scalar-prefetched into SMEM, drive every index_map).
    qi_list, ki_list = [], []
    for qi in range(nq):
        for ki in range(qi + 1):
            qi_list.append(qi)
            ki_list.append(ki)
    qi_tbl = jnp.asarray(qi_list, dtype=jnp.int32)
    ki_tbl = jnp.asarray(ki_list, dtype=jnp.int32)
    n_steps = len(qi_list)

    q_spec = pl.BlockSpec((1, HG, TS, dh), lambda b, g, s, qt, kt: (b, g, qt[s], 0))
    kv_spec = pl.BlockSpec((1, HG, TS, dh), lambda b, g, s, qt, kt: (b, g, kt[s], 0))
    o_spec = pl.BlockSpec((1, HG, TS, dh), lambda b, g, s, qt, kt: (b, g, qt[s], 0))

    kernel = functools.partial(_attn_kernel, ts=TS, bf16_exp=_bf16_exp_ok())
    return pl.pallas_call(
        kernel,
        out_shape=jax.ShapeDtypeStruct((B, H, T, dh), jnp.bfloat16),
        grid_spec=pltpu.PrefetchScalarGridSpec(
            num_scalar_prefetch=2,
            grid=(B, n_hg, n_steps),
            in_specs=[q_spec, kv_spec, kv_spec],
            out_specs=o_spec,
            scratch_shapes=[pltpu.VMEM((HG, TS, 1), jnp.float32),    # running max
                            pltpu.VMEM((HG, TS, 1), jnp.float32),    # running denom
                            pltpu.VMEM((HG, TS, dh), jnp.float32)]), # running numerator
        compiler_params=_compiler_params(("parallel", "parallel", "arbitrary")),
    )(qi_tbl, ki_tbl, q, k, v)


# ----------------------- kernel 3: head merge + out proj + LN2(+res) + MLP(+res) -----------------------
def _ffn_kernel(ctx_ref, x_ref, wo_ref, bo_ref, ln2w_ref, ln2b_ref,
                w1_ref, b1_ref, w2_ref, b2_ref, o_ref, att_scr,
                *, n_heads, with_residuals):
    E = x_ref.shape[2]
    dh = E // n_heads
    for hh in range(n_heads):                       # head merge once per T-tile (amortized)
        att_scr[:, hh * dh:(hh + 1) * dh] = ctx_ref[0, hh]
    att = jnp.dot(att_scr[...], wo_ref[...], preferred_element_type=jnp.float32) + bo_ref[...]
    h2 = _layernorm(att, ln2w_ref[...], ln2b_ref[...])
    if with_residuals:
        h2 = h2 + x_ref[0]
    m = jnp.dot(h2.astype(jnp.bfloat16), w1_ref[...],
                preferred_element_type=jnp.float32) + b1_ref[...]
    m = _gelu(m)
    m = jnp.dot(m.astype(jnp.bfloat16), w2_ref[...],
                preferred_element_type=jnp.float32) + b2_ref[...]
    if with_residuals:
        m = m + h2
    o_ref[0] = m


def run_ffn(ctx, x, lp, n_heads, with_residuals, seq_tile):
    B, T, E = x.shape
    TS = _pick_tile(T, seq_tile, 8)
    nq = T // TS
    dh = E // n_heads
    bf = jnp.bfloat16
    # TODO(synk): once verified on the target jax version, pipeline_mode=pl.Buffered(1) on these
    # constant-index weight specs would drop their double-buffered VMEM footprint on v7x.
    weights = [lp['wo'].astype(bf), lp['bo'], lp['ln2_w'], lp['ln2_b'],
               lp['w1'].astype(bf), lp['b1'], lp['w2'].astype(bf), lp['b2']]

    def wspec(a):
        nd = a.ndim
        return pl.BlockSpec(a.shape, lambda b, ti, _nd=nd: (0,) * _nd)

    kernel = functools.partial(_ffn_kernel, n_heads=n_heads, with_residuals=with_residuals)
    return pl.pallas_call(
        kernel,
        out_shape=jax.ShapeDtypeStruct((B, T, E), jnp.float32),
        grid=(B, nq),
        in_specs=[pl.BlockSpec((1, n_heads, TS, dh), lambda b, ti: (b, 0, ti, 0)),
                  pl.BlockSpec((1, TS, E), lambda b, ti: (b, ti, 0))]
                 + [wspec(a) for a in weights],
        out_specs=pl.BlockSpec((1, TS, E), lambda b, ti: (b, ti, 0)),
        scratch_shapes=[pltpu.VMEM((TS, E), bf)],   # head-merge buffer
        compiler_params=_compiler_params(("parallel", "parallel")),
    )(ctx, x, *weights)


# ------------------------ final LayerNorm + word_prediction kernel ------------------------
def _head_kernel(x_ref, lnw_ref, lnb_ref, wp_ref, bp_ref, o_ref):
    h = _layernorm(x_ref[0], lnw_ref[...], lnb_ref[...])     # recompute per vocab tile: cheap
    o_ref[0] = (jnp.dot(h.astype(jnp.bfloat16), wp_ref[...],
                        preferred_element_type=jnp.float32) + bp_ref[...]).astype(o_ref.dtype)


def run_head(x, lnw, lnb, wp, bp, seq_tile=1024, vocab_tile=2048, logits_dtype=jnp.float32):
    # Large TT/TV tiles: the (E,V) weight is re-streamed far less often (HBM-bound kernel).
    # TODO(synk): logits_dtype=bf16 (or fused softmax/loss) would halve the largest HBM write,
    # but f32 is kept by default to match the PyTorch module's output dtype.
    B, T, E = x.shape
    V = wp.shape[1]
    TT = _pick_tile(T, seq_tile, 8)
    TV = _pick_tile(V, vocab_tile, 128)
    wp16 = wp.astype(jnp.bfloat16)
    return pl.pallas_call(
        _head_kernel,
        out_shape=jax.ShapeDtypeStruct((B, T, V), logits_dtype),
        grid=(B, T // TT, V // TV),
        in_specs=[pl.BlockSpec((1, TT, E), lambda b, ti, vi: (b, ti, 0)),
                  pl.BlockSpec(lnw.shape, lambda b, ti, vi: (0, 0)),
                  pl.BlockSpec(lnb.shape, lambda b, ti, vi: (0, 0)),
                  pl.BlockSpec((E, TV), lambda b, ti, vi: (0, vi)),
                  pl.BlockSpec((1, TV), lambda b, ti, vi: (0, vi))],
        out_specs=pl.BlockSpec((1, TT, TV), lambda b, ti, vi: (b, ti, vi)),
        compiler_params=_compiler_params(("parallel", "parallel", "parallel")),
    )(x, lnw, lnb, wp16, bp)


# ----------------------------- parameters & full forward -----------------------------
def init_params(key, n_layers, embed_size, max_context_len, vocab_size, mlp_hidden_size):
    keys = iter(jax.random.split(key, 4 + 12 * n_layers))

    def xavier(k, fan_in, fan_out, shape):
        std = (2.0 / (fan_in + fan_out)) ** 0.5
        return std * jax.random.normal(k, shape, jnp.float32)

    E, V, H, C = embed_size, vocab_size, mlp_hidden_size, max_context_len
    params = {
        'tok_emb': xavier(next(keys), V, E, (V, E)),
        'pos_emb': xavier(next(keys), C, E, (C, E)),
        'layers': [],
        'ln_f_w': jnp.ones((1, E), jnp.float32),
        'ln_f_b': jnp.zeros((1, E), jnp.float32),
    }
    for _ in range(n_layers):
        layer = {'ln1_w': jnp.ones((1, E), jnp.float32),
                 'ln1_b': jnp.zeros((1, E), jnp.float32),
                 'ln2_w': jnp.ones((1, E), jnp.float32),
                 'ln2_b': jnp.zeros((1, E), jnp.float32)}
        wq = xavier(next(keys), E, E, (E, E)); bq = jax.random.normal(next(keys), (1, E), jnp.float32)
        wk = xavier(next(keys), E, E, (E, E)); bk = jax.random.normal(next(keys), (1, E), jnp.float32)
        wv = xavier(next(keys), E, E, (E, E)); bv = jax.random.normal(next(keys), (1, E), jnp.float32)
        layer['wqkv'] = jnp.concatenate([wq, wk, wv], axis=1)   # fused (E, 3E) QKV projection
        layer['bqkv'] = jnp.concatenate([bq, bk, bv], axis=1)   # (1, 3E)
        layer['wo'] = xavier(next(keys), E, E, (E, E))
        layer['bo'] = jax.random.normal(next(keys), (1, E), jnp.float32)
        layer['w1'] = xavier(next(keys), E, H, (E, H))
        layer['b1'] = jax.random.normal(next(keys), (1, H), jnp.float32)
        layer['w2'] = xavier(next(keys), H, E, (H, E))
        layer['b2'] = jax.random.normal(next(keys), (1, E), jnp.float32)
        params['layers'].append(layer)
    params['wp'] = xavier(next(keys), E, V, (E, V))
    params['bp'] = jax.random.normal(next(keys), (1, V), jnp.float32)
    return params


def transformer_lm_forward(tokens, params, n_heads, with_residuals, seq_tile=256):
    # Embed (glue: data-dependent gather stays in plain JAX).
    T = tokens.shape[-1]
    x = params['tok_emb'][tokens] + params['pos_emb'][:T][None, :, :]
    x = x.astype(jnp.float32)
    # TODO(synk): cross-pallas_call weight prefetch (P10: sem+VMEM futures) would hide each
    # layer's weight DMA under the previous layer's compute.
    for lp in params['layers']:
        q, k, v = run_qkv(x, lp['ln1_w'], lp['ln1_b'], lp['wqkv'], lp['bqkv'],
                          n_heads, seq_tile)
        ctx = run_attention(q, k, v, seq_tile)
        x = run_ffn(ctx, x, lp, n_heads, with_residuals, seq_tile)
    return run_head(x, params['ln_f_w'], params['ln_f_b'], params['wp'], params['bp'])


if __name__ == "__main__":
    n_layers = 2
    n_heads = 4
    embed_size = 32
    max_context_len = 16
    vocab_size = 64
    mlp_hidden_size = 64
    with_residuals = True
    B, T = 2, 8

    key = jax.random.PRNGKey(0)
    pkey, tkey = jax.random.split(key)
    params = init_params(pkey, n_layers, embed_size, max_context_len,
                         vocab_size, mlp_hidden_size)
    tokens = jax.random.randint(tkey, (B, T), 0, vocab_size, dtype=jnp.int32)

    logits = transformer_lm_forward(tokens, params, n_heads, with_residuals)
    logits = jax.block_until_ready(logits)
    assert logits.shape == (B, T, vocab_size), logits.shape
    assert jnp.all(jnp.isfinite(logits))
    print("KERNEL_OK")
</pallas_src>

<mosaic_0001>
module attributes {stable_mosaic.version = 11 : i64} {
  func.func @_qkv_kernel(%arg0: i32, %arg1: i32, %arg2: memref<1x8x32xf32, #tpu.memory_space<vmem>>, %arg3: memref<1x32xf32, #tpu.memory_space<vmem>>, %arg4: memref<1x32xf32, #tpu.memory_space<vmem>>, %arg5: memref<32x96xbf16, #tpu.memory_space<vmem>>, %arg6: memref<1x96xf32, #tpu.memory_space<vmem>>, %arg7: memref<1x4x8x8xbf16, #tpu.memory_space<vmem>>, %arg8: memref<1x4x8x8xbf16, #tpu.memory_space<vmem>>, %arg9: memref<1x4x8x8xbf16, #tpu.memory_space<vmem>>) attributes {dimension_semantics = [#tpu.dimension_semantics<parallel>, #tpu.dimension_semantics<parallel>], iteration_bounds = array<i64: 2, 1>, scalar_prefetch = 0 : i64, scratch_operands = 0 : i64, tpu.core_type = #tpu.core_type<tc>, window_params = [{transform_indices = @transform_0, window_bounds = array<i64: 1, 8, 32>}, {pipeline_mode = #tpu.pipeline_mode<synchronous>, transform_indices = @transform_1, window_bounds = array<i64: 1, 32>}, {pipeline_mode = #tpu.pipeline_mode<synchronous>, transform_indices = @transform_2, window_bounds = array<i64: 1, 32>}, {pipeline_mode = #tpu.pipeline_mode<synchronous>, transform_indices = @transform_3, window_bounds = array<i64: 32, 96>}, {pipeline_mode = #tpu.pipeline_mode<synchronous>, transform_indices = @transform_4, window_bounds = array<i64: 1, 96>}, {transform_indices = @transform_5, window_bounds = array<i64: 1, 4, 8, 8>}, {transform_indices = @transform_6, window_bounds = array<i64: 1, 4, 8, 8>}, {transform_indices = @transform_7, window_bounds = array<i64: 1, 4, 8, 8>}]} {
    %c0 = arith.constant 0 : index
    %c0_0 = arith.constant 0 : index
    %c0_1 = arith.constant 0 : index
    %0 = vector.load %arg2[%c0, %c0_0, %c0_1] : memref<1x8x32xf32, #tpu.memory_space<vmem>>, vector<1x8x32xf32>
    %1 = vector.shape_cast %0 : vector<1x8x32xf32> to vector<8x32xf32>
    %c0_2 = arith.constant 0 : index
    %c0_3 = arith.constant 0 : index
    %2 = vector.load %arg3[%c0_2, %c0_3] : memref<1x32xf32, #tpu.memory_space<vmem>>, vector<1x32xf32>
    %c0_4 = arith.constant 0 : index
    %c0_5 = arith.constant 0 : index
    %3 = vector.load %arg4[%c0_4, %c0_5] : memref<1x32xf32, #tpu.memory_space<vmem>>, vector<1x32xf32>
    %cst = arith.constant dense<0.000000e+00> : vector<8xf32>
    %4 = vector.multi_reduction <add>, %1, %cst [1] : vector<8x32xf32> to vector<8xf32>
    %5 = vector.shape_cast %4 : vector<8xf32> to vector<8x1xf32>
    %cst_6 = arith.constant 3.200000e+01 : f32
    %6 = vector.broadcast %cst_6 : f32 to vector<8x1xf32>
    %7 = arith.divf %5, %6 : vector<8x1xf32>
    %8 = vector.broadcast %7 : vector<8x1xf32> to vector<8x32xf32>
    %9 = arith.subf %1, %8 : vector<8x32xf32>
    %10 = arith.mulf %9, %9 : vector<8x32xf32>
    %cst_7 = arith.constant dense<0.000000e+00> : vector<8xf32>
    %11 = vector.multi_reduction <add>, %10, %cst_7 [1] : vector<8x32xf32> to vector<8xf32>
    %12 = vector.shape_cast %11 : vector<8xf32> to vector<8x1xf32>
    %cst_8 = arith.constant 3.200000e+01 : f32
    %13 = vector.broadcast %cst_8 : f32 to vector<8x1xf32>
    %14 = arith.divf %12, %13 : vector<8x1xf32>
    %15 = vector.broadcast %7 : vector<8x1xf32> to vector<8x32xf32>
    %16 = arith.subf %1, %15 : vector<8x32xf32>
    %cst_9 = arith.constant 9.99999974E-6 : f32
    %17 = vector.broadcast %cst_9 : f32 to vector<8x1xf32>
    %18 = arith.addf %14, %17 : vector<8x1xf32>
    %19 = math.rsqrt %18 : vector<8x1xf32>
    %20 = vector.broadcast %19 : vector<8x1xf32> to vector<8x32xf32>
    %21 = arith.mulf %16, %20 : vector<8x32xf32>
    %22 = vector.broadcast %2 : vector<1x32xf32> to vector<8x32xf32>
    %23 = arith.mulf %21, %22 : vector<8x32xf32>
    %24 = vector.broadcast %3 : vector<1x32xf32> to vector<8x32xf32>
    %25 = arith.addf %23, %24 : vector<8x32xf32>
    %26 = arith.truncf %25 : vector<8x32xf32> to vector<8x32xbf16>
    %c0_10 = arith.constant 0 : index
    %c0_11 = arith.constant 0 : index
    %27 = vector.load %arg5[%c0_10, %c0_11] : memref<32x96xbf16, #tpu.memory_space<vmem>>, vector<32x96xbf16>
    %cst_12 = arith.constant dense<0.000000e+00> : vector<8x96xf32>
    %28 = tpu.matmul %26, %27, %cst_12 {dimension_numbers = #tpu.dot_dimension_numbers<[1], [0], [0], [1], [0, 0, 1, 1], [], []>} : vector<8x32xbf16>, vector<32x96xbf16>, vector<8x96xf32> -> vector<8x96xf32>
    %c0_13 = arith.constant 0 : index
    %c0_14 = arith.constant 0 : index
    %29 = vector.load %arg6[%c0_13, %c0_14] : memref<1x96xf32, #tpu.memory_space<vmem>>, vector<1x96xf32>
    %30 = vector.broadcast %29 : vector<1x96xf32> to vector<8x96xf32>
    %31 = arith.addf %28, %30 : vector<8x96xf32>
    %32 = vector.extract_strided_slice %31 {offsets = [0, 0], sizes = [8, 32], strides = [1, 1]} : vector<8x96xf32> to vector<8x32xf32>
    %cst_15 = arith.constant 0.353553385 : f32
    %33 = vector.broadcast %cst_15 : f32 to vector<8x32xf32>
    %34 = arith.mulf %32, %33 : vector<8x32xf32>
    %35 = vector.extract_strided_slice %31 {offsets = [0, 32], sizes = [8, 32], strides = [1, 1]} : vector<8x96xf32> to vector<8x32xf32>
    %36 = vector.extract_strided_slice %31 {offsets = [0, 64], sizes = [8, 32], strides = [1, 1]} : vector<8x96xf32> to vector<8x32xf32>
    %37 = vector.extract_strided_slice %34 {offsets = [0, 0], sizes = [8, 8], strides = [1, 1]} : vector<8x32xf32> to vector<8x8xf32>
    %38 = arith.truncf %37 : vector<8x8xf32> to vector<8x8xbf16>
    %c0_16 = arith.constant 0 : index
    %c0_17 = arith.constant 0 : index
    %c0_18 = arith.constant 0 : index
    %c0_19 = arith.constant 0 : index
    %39 = vector.load %arg7[%c0_16, %c0_17, %c0_18, %c0_19] : memref<1x4x8x8xbf16, #tpu.memory_space<vmem>>, vector<1x1x8x8xbf16>
    %40 = vector.shape_cast %39 : vector<1x1x8x8xbf16> to vector<8x8xbf16>
    %41 = vector.shape_cast %38 : vector<8x8xbf16> to vector<1x1x8x8xbf16>
    tpu.vector_store %arg7[%c0_16, %c0_17, %c0_18, %c0_19], %41 {strides = array<i32>} : memref<1x4x8x8xbf16, #tpu.memory_space<vmem>>, vector<1x1x8x8xbf16>,
    %42 = vector.extract_strided_slice %35 {offsets = [0, 0], sizes = [8, 8], strides = [1, 1]} : vector<8x32xf32> to vector<8x8xf32>
    %43 = arith.truncf %42 : vector<8x8xf32> to vector<8x8xbf16>
    %c0_20 = arith.constant 0 : index
    %c0_21 = arith.constant 0 : index
    %c0_22 = arith.constant 0 : index
    %c0_23 = arith.constant 0 : index
    %44 = vector.load %arg8[%c0_20, %c0_21, %c0_22, %c0_23] : memref<1x4x8x8xbf16, #tpu.memory_space<vmem>>, vector<1x1x8x8xbf16>
    %45 = vector.shape_cast %44 : vector<1x1x8x8xbf16> to vector<8x8xbf16>
    %46 = vector.shape_cast %43 : vector<8x8xbf16> to vector<1x1x8x8xbf16>
    tpu.vector_store %arg8[%c0_20, %c0_21, %c0_22, %c0_23], %46 {strides = array<i32>} : memref<1x4x8x8xbf16, #tpu.memory_space<vmem>>, vector<1x1x8x8xbf16>,
    %47 = vector.extract_strided_slice %36 {offsets = [0, 0], sizes = [8, 8], strides = [1, 1]} : vector<8x32xf32> to vector<8x8xf32>
    %48 = arith.truncf %47 : vector<8x8xf32> to vector<8x8xbf16>
    %c0_24 = arith.constant 0 : index
    %c0_25 = arith.constant 0 : index
    %c0_26 = arith.constant 0 : index
    %c0_27 = arith.constant 0 : index
    %49 = vector.load %arg9[%c0_24, %c0_25, %c0_26, %c0_27] : memref<1x4x8x8xbf16, #tpu.memory_space<vmem>>, vector<1x1x8x8xbf16>
    %50 = vector.shape_cast %49 : vector<1x1x8x8xbf16> to vector<8x8xbf16>
    %51 = vector.shape_cast %48 : vector<8x8xbf16> to vector<1x1x8x8xbf16>
    tpu.vector_store %arg9[%c0_24, %c0_25, %c0_26, %c0_27], %51 {strides = array<i32>} : memref<1x4x8x8xbf16, #tpu.memory_space<vmem>>, vector<1x1x8x8xbf16>,
    %52 = vector.extract_strided_slice %34 {offsets = [0, 8], sizes = [8, 8], strides = [1, 1]} : vector<8x32xf32> to vector<8x8xf32>
    %53 = arith.truncf %52 : vector<8x8xf32> to vector<8x8xbf16>
    %c0_28 = arith.constant 0 : index
    %c1 = arith.constant 1 : index
    %c0_29 = arith.constant 0 : index
    %c0_30 = arith.constant 0 : index
    %54 = vector.load %arg7[%c0_28, %c1, %c0_29, %c0_30] : memref<1x4x8x8xbf16, #tpu.memory_space<vmem>>, vector<1x1x8x8xbf16>
    %55 = vector.shape_cast %54 : vector<1x1x8x8xbf16> to vector<8x8xbf16>
    %56 = vector.shape_cast %53 : vector<8x8xbf16> to vector<1x1x8x8xbf16>
    tpu.vector_store %arg7[%c0_28, %c1, %c0_29, %c0_30], %56 {strides = array<i32>} : memref<1x4x8x8xbf16, #tpu.memory_space<vmem>>, vector<1x1x8x8xbf16>,
    %57 = vector.extract_strided_slice %35 {offsets = [0, 8], sizes = [8, 8], strides = [1, 1]} : vector<8x32xf32> to vector<8x8xf32>
    %58 = arith.truncf %57 : vector<8x8xf32> to vector<8x8xbf16>
    %c0_31 = arith.constant 0 : index
    %c1_32 = arith.constant 1 : index
    %c0_33 = arith.constant 0 : index
    %c0_34 = arith.constant 0 : index
    %59 = vector.load %arg8[%c0_31, %c1_32, %c0_33, %c0_34] : memref<1x4x8x8xbf16, #tpu.memory_space<vmem>>, vector<1x1x8x8xbf16>
    %60 = vector.shape_cast %59 : vector<1x1x8x8xbf16> to vector<8x8xbf16>
    %61 = vector.shape_cast %58 : vector<8x8xbf16> to vector<1x1x8x8xbf16>
    tpu.vector_store %arg8[%c0_31, %c1_32, %c0_33, %c0_34], %61 {strides = array<i32>} : memref<1x4x8x8xbf16, #tpu.memory_space<vmem>>, vector<1x1x8x8xbf16>,
    %62 = vector.extract_strided_slice %36 {offsets = [0, 8], sizes = [8, 8], strides = [1, 1]} : vector<8x32xf32> to vector<8x8xf32>
    %63 = arith.truncf %62 : vector<8x8xf32> to vector<8x8xbf16>
    %c0_35 = arith.constant 0 : index
    %c1_36 = arith.constant 1 : index
    %c0_37 = arith.constant 0 : index
    %c0_38 = arith.constant 0 : index
    %64 = vector.load %arg9[%c0_35, %c1_36, %c0_37, %c0_38] : memref<1x4x8x8xbf16, #tpu.memory_space<vmem>>, vector<1x1x8x8xbf16>
    %65 = vector.shape_cast %64 : vector<1x1x8x8xbf16> to vector<8x8xbf16>
    %66 = vector.shape_cast %63 : vector<8x8xbf16> to vector<1x1x8x8xbf16>
    tpu.vector_store %arg9[%c0_35, %c1_36, %c0_37, %c0_38], %66 {strides = array<i32>} : memref<1x4x8x8xbf16, #tpu.memory_space<vmem>>, vector<1x1x8x8xbf16>,
    %67 = vector.extract_strided_slice %34 {offsets = [0, 16], sizes = [8, 8], strides = [1, 1]} : vector<8x32xf32> to vector<8x8xf32>
    %68 = arith.truncf %67 : vector<8x8xf32> to vector<8x8xbf16>
    %c0_39 = arith.constant 0 : index
    %c2 = arith.constant 2 : index
    %c0_40 = arith.constant 0 : index
    %c0_41 = arith.constant 0 : index
    %69 = vector.load %arg7[%c0_39, %c2, %c0_40, %c0_41] : memref<1x4x8x8xbf16, #tpu.memory_space<vmem>>, vector<1x1x8x8xbf16>
    %70 = vector.shape_cast %69 : vector<1x1x8x8xbf16> to vector<8x8xbf16>
    %71 = vector.shape_cast %68 : vector<8x8xbf16> to vector<1x1x8x8xbf16>
    tpu.vector_store %arg7[%c0_39, %c2, %c0_40, %c0_41], %71 {strides = array<i32>} : memref<1x4x8x8xbf16, #tpu.memory_space<vmem>>, vector<1x1x8x8xbf16>,
    %72 = vector.extract_strided_slice %35 {offsets = [0, 16], sizes = [8, 8], strides = [1, 1]} : vector<8x32xf32> to vector<8x8xf32>
    %73 = arith.truncf %72 : vector<8x8xf32> to vector<8x8xbf16>
    %c0_42 = arith.constant 0 : index
    %c2_43 = arith.constant 2 : index
    %c0_44 = arith.constant 0 : index
    %c0_45 = arith.constant 0 : index
    %74 = vector.load %arg8[%c0_42, %c2_43, %c0_44, %c0_45] : memref<1x4x8x8xbf16, #tpu.memory_space<vmem>>, vector<1x1x8x8xbf16>
    %75 = vector.shape_cast %74 : vector<1x1x8x8xbf16> to vector<8x8xbf16>
    %76 = vector.shape_cast %73 : vector<8x8xbf16> to vector<1x1x8x8xbf16>
    tpu.vector_store %arg8[%c0_42, %c2_43, %c0_44, %c0_45], %76 {strides = array<i32>} : memref<1x4x8x8xbf16, #tpu.memory_space<vmem>>, vector<1x1x8x8xbf16>,
    %77 = vector.extract_strided_slice %36 {offsets = [0, 16], sizes = [8, 8], strides = [1, 1]} : vector<8x32xf32> to vector<8x8xf32>
    %78 = arith.truncf %77 : vector<8x8xf32> to vector<8x8xbf16>
    %c0_46 = arith.constant 0 : index
    %c2_47 = arith.constant 2 : index
    %c0_48 = arith.constant 0 : index
    %c0_49 = arith.constant 0 : index
    %79 = vector.load %arg9[%c0_46, %c2_47, %c0_48, %c0_49] : memref<1x4x8x8xbf16, #tpu.memory_space<vmem>>, vector<1x1x8x8xbf16>
    %80 = vector.shape_cast %79 : vector<1x1x8x8xbf16> to vector<8x8xbf16>
    %81 = vector.shape_cast %78 : vector<8x8xbf16> to vector<1x1x8x8xbf16>
    tpu.vector_store %arg9[%c0_46, %c2_47, %c0_48, %c0_49], %81 {strides = array<i32>} : memref<1x4x8x8xbf16, #tpu.memory_space<vmem>>, vector<1x1x8x8xbf16>,
    %82 = vector.extract_strided_slice %34 {offsets = [0, 24], sizes = [8, 8], strides = [1, 1]} : vector<8x32xf32> to vector<8x8xf32>
    %83 = arith.truncf %82 : vector<8x8xf32> to vector<8x8xbf16>
    %c0_50 = arith.constant 0 : index
    %c3 = arith.constant 3 : index
    %c0_51 = arith.constant 0 : index
    %c0_52 = arith.constant 0 : index
    %84 = vector.load %arg7[%c0_50, %c3, %c0_51, %c0_52] : memref<1x4x8x8xbf16, #tpu.memory_space<vmem>>, vector<1x1x8x8xbf16>
    %85 = vector.shape_cast %84 : vector<1x1x8x8xbf16> to vector<8x8xbf16>
    %86 = vector.shape_cast %83 : vector<8x8xbf16> to vector<1x1x8x8xbf16>
    tpu.vector_store %arg7[%c0_50, %c3, %c0_51, %c0_52], %86 {strides = array<i32>} : memref<1x4x8x8xbf16, #tpu.memory_space<vmem>>, vector<1x1x8x8xbf16>,
    %87 = vector.extract_strided_slice %35 {offsets = [0, 24], sizes = [8, 8], strides = [1, 1]} : vector<8x32xf32> to vector<8x8xf32>
    %88 = arith.truncf %87 : vector<8x8xf32> to vector<8x8xbf16>
    %c0_53 = arith.constant 0 : index
    %c3_54 = arith.constant 3 : index
    %c0_55 = arith.constant 0 : index
    %c0_56 = arith.constant 0 : index
    %89 = vector.load %arg8[%c0_53, %c3_54, %c0_55, %c0_56] : memref<1x4x8x8xbf16, #tpu.memory_space<vmem>>, vector<1x1x8x8xbf16>
    %90 = vector.shape_cast %89 : vector<1x1x8x8xbf16> to vector<8x8xbf16>
    %91 = vector.shape_cast %88 : vector<8x8xbf16> to vector<1x1x8x8xbf16>
    tpu.vector_store %arg8[%c0_53, %c3_54, %c0_55, %c0_56], %91 {strides = array<i32>} : memref<1x4x8x8xbf16, #tpu.memory_space<vmem>>, vector<1x1x8x8xbf16>,
    %92 = vector.extract_strided_slice %36 {offsets = [0, 24], sizes = [8, 8], strides = [1, 1]} : vector<8x32xf32> to vector<8x8xf32>
    %93 = arith.truncf %92 : vector<8x8xf32> to vector<8x8xbf16>
    %c0_57 = arith.constant 0 : index
    %c3_58 = arith.constant 3 : index
    %c0_59 = arith.constant 0 : index
    %c0_60 = arith.constant 0 : index
    %94 = vector.load %arg9[%c0_57, %c3_58, %c0_59, %c0_60] : memref<1x4x8x8xbf16, #tpu.memory_space<vmem>>, vector<1x1x8x8xbf16>
    %95 = vector.shape_cast %94 : vector<1x1x8x8xbf16> to vector<8x8xbf16>
    %96 = vector.shape_cast %93 : vector<8x8xbf16> to vector<1x1x8x8xbf16>
    tpu.vector_store %arg9[%c0_57, %c3_58, %c0_59, %c0_60], %96 {strides = array<i32>} : memref<1x4x8x8xbf16, #tpu.memory_space<vmem>>, vector<1x1x8x8xbf16>,
    return
  }
  func.func @transform_0(%arg0: i32, %arg1: i32) -> (i32, i32, i32) {
    %c0_i32 = arith.constant 0 : i32
    %c0_i32_0 = arith.constant 0 : i32
    return %arg0, %arg1, %c0_i32 : i32, i32, i32
  }
  func.func @transform_1(%arg0: i32, %arg1: i32) -> (i32, i32) {
    %c0_i32 = arith.constant 0 : i32
    %c0_i32_0 = arith.constant 0 : i32
    %c0_i32_1 = arith.constant 0 : i32
    return %c0_i32, %c0_i32_0 : i32, i32
  }
  func.func @transform_2(%arg0: i32, %arg1: i32) -> (i32, i32) {
    %c0_i32 = arith.constant 0 : i32
    %c0_i32_0 = arith.constant 0 : i32
    %c0_i32_1 = arith.constant 0 : i32
    return %c0_i32, %c0_i32_0 : i32, i32
  }
  func.func @transform_3(%arg0: i32, %arg1: i32) -> (i32, i32) {
    %c0_i32 = arith.constant 0 : i32
    %c0_i32_0 = arith.constant 0 : i32
    %c0_i32_1 = arith.constant 0 : i32
    return %c0_i32, %c0_i32_0 : i32, i32
  }
  func.func @transform_4(%arg0: i32, %arg1: i32) -> (i32, i32) {
    %c0_i32 = arith.constant 0 : i32
    %c0_i32_0 = arith.constant 0 : i32
    %c0_i32_1 = arith.constant 0 : i32
    return %c0_i32, %c0_i32_0 : i32, i32
  }
  func.func @transform_5(%arg0: i32, %arg1: i32) -> (i32, i32, i32, i32) {
    %c0_i32 = arith.constant 0 : i32
    %c0_i32_0 = arith.constant 0 : i32
    %c0_i32_1 = arith.constant 0 : i32
    return %arg0, %c0_i32, %arg1, %c0_i32_0 : i32, i32, i32, i32
  }
  func.func @transform_6(%arg0: i32, %arg1: i32) -> (i32, i32, i32, i32) {
    %c0_i32 = arith.constant 0 : i32
    %c0_i32_0 = arith.constant 0 : i32
    %c0_i32_1 = arith.constant 0 : i32
    return %arg0, %c0_i32, %arg1, %c0_i32_0 : i32, i32, i32, i32
  }
  func.func @transform_7(%arg0: i32, %arg1: i32) -> (i32, i32, i32, i32) {
    %c0_i32 = arith.constant 0 : i32
    %c0_i32_0 = arith.constant 0 : i32
    %c0_i32_1 = arith.constant 0 : i32
    return %arg0, %c0_i32, %arg1, %c0_i32_0 : i32, i32, i32, i32
  }
}

</mosaic_0001>

<bundles_post_ra>
// kernel: tpu_custom_call.1
= control target key start
LH: loop header
LB: loop body
LE: loop exit
PB: predicated region body
PF: predicated region fallthrough
CT: control target
= control target key end

     0   :  { %s1495_s0 = inlined_call_operand.hbm [shape: f32[2,8,32], index: 0, kind: input, shape index: {}]   ;;  %s1496_s1 = inlined_call_operand.vmem [shape: f32[1,32], index: 1, kind: input, shape index: {}]   ;;  %s1497_s2 = inlined_call_operand.vmem [shape: f32[1,32], index: 2, kind: input, shape index: {}]   ;;  %s1498_s3 = inlined_call_operand.hbm [shape: bf16[32,96], index: 3, kind: input, shape index: {}]   ;;  %s1499_s4 = inlined_call_operand.vmem [shape: f32[1,96], index: 4, kind: input, shape index: {}]   ;;  %s1500_s5 = inlined_call_operand.hbm [shape: bf16[2,4,8,8], index: 5, kind: output, shape index: {0}]   ;;  %s1501_s6 = inlined_call_operand.hbm [shape: bf16[2,4,8,8], index: 6, kind: output, shape index: {1}]   ;;  %s1502_s7 = inlined_call_operand.hbm [shape: bf16[2,4,8,8], index: 7, kind: output, shape index: {2}]  }
   0x1   :  { %1510 = sst [smem:[#allocation16_spill]] %s1498_s3 }
   0x2   :  { %13 = vsyncpa [#allocation3], 0 }
   0x3   :  { %15 = vsyncpa [#allocation3 + $0x1], 0 }
   0x4   :  { %16 = vsyncpa [#allocation6], 0 }
   0x5   :  { %17 = vsyncpa [#allocation4], 0 }
   0x6   :  { %19 = vsyncpa [#allocation4 + $0x1], 0 }
   0x7   :  { %20 = vsyncpa [#allocation9], 0 }
   0x8   :  { %22 = vsyncpa [#allocation9 + $0x1], 0  ;;  %s1157_s24 = smov 0   ;;  %s1159_s25 = smov 0  }
   0x9   :  { %s1161_s26 = smov 0   ;;  %s1163_s27 = smov 0  }
   0xa   :  { %s1165_s28 = smov 0   ;;  %s1167_s29 = smov 0  }
   0xb LB: > { %s1188_s30 = sadd.s32 4294967295, %s1094_s29   ;;  %s1506_s8 = sadd.s32 4294967294, %s1094_s29   ;;  %s1094_s29 = sphi %s1167_s29, %s28_s29   ;;  %s1090_s28 = sphi %s1165_s28, %s1535_s28   ;;  %s1086_s27 = sphi %s1163_s27, %s1534_s27   ;;  %s1082_s26 = sphi %s1161_s26, %s1533_s26   ;;  %s1078_s25 = sphi %s1159_s25, %s1532_s25   ;;  %s1074_s24 = sphi %s1157_s24, %s1531_s24  }
   0xc   : > { %p62_p0 = scmp.ne.s32.totalorder %s1078_s25, %s1074_s24  ;;  %p1503_p1 = scmp.eq.s32.totalorder %s1188_s30, 0 }
   0xd   : > { %p178_p3 = scmp.eq.s32.totalorder %s1506_s8, 1  ;;  %p732_p5 = scmp.ge.s32.totalorder %s1094_s29, 1 }
   0xe   : > { %p1199_p4 = por %p1503_p1, %p62_p0  ;;  %p241_p7 = scmp.lt.s32.totalorder %s1094_s29, 3 }
   0xf   : > { %p1204_p6 = por %p178_p3, %p62_p0  ;;  %s1096_s12 = smov [#allocation5]  }
  0x10   : > { %s1511_s9 = scalar_select %p1199_p4, 1, 0 }
  0x11   : > { %s1512_s10 = scalar_select %p1204_p6, 1, 0 }
  0x12   : > { %p1209_p8 = pnand %p732_p5, %p241_p7  ;;  %s259_s13 = sshll.u32 %s1096_s12, 4  ;;  %s260_s13 = int_to_ptr.vmem [resolvable:$true] %s259_s13 }
  0x13   : > { %s40_s15 = sadd.s32 1, %s1090_s28  ;;  %s1515_s3 = sld [smem:[#allocation16_spill]] }
  0x14   : > { %s1513_s11 = scalar_select %p1209_p8, 1, 0 }
  0x15   : > { %p799_p9 = pneg %p1209_p8 }
  0x17   : > { %p1218_p11 = pnand %p799_p9, %p1503_p1 }
  0x19   : > { %s890_s18 = scalar_lea.hbm %s1515_s3, 256  ;;  %p892_p13 = pneg %p1218_p11 }
  0x1a   : > { %p891_p12 = scmp.ne.s32.totalorder %s1515_s3, %s890_s18  ;;  %p897_p5 = scmp.lt.u32.totalorder %s890_s18, %s1515_s3 }
  0x1c   : > { %p893_p0 = pnand %p892_p13, %p891_p12 }
  0x1e   : > { %p894_p3 = pneg %p893_p0 }
  0x20   : > { %p899_p7 = pnand %p897_p5, %p894_p3 }
  0x22   : > { %902 = shalt.err (!%p899_p7)
}
  0x23   : > { %s903_s23 = scalar_lea.vmem %s260_s13, 256  ;;  %p911_p2 = scmp.lt.s32.totalorder %s260_s13, %s260_s13 }
  0x24   : > { %p904_p9 = scmp.ne.s32.totalorder %s260_s13, %s903_s23  ;;  %p912_p6 = scmp.lt.s32.totalorder %s903_s23, %s903_s23 }
  0x26   : > { %p906_p10 = pnand %p904_p9, %p892_p13  ;;  %p913_p4 = por %p912_p6, %p911_p2 }
  0x28   : > { %p907_p1 = pneg %p906_p10 }
  0x2a   : > { %p914_p8 = pnand %p913_p4, %p907_p1 }
  0x2c   : > { %917 = shalt.err (!%p914_p8)
}
  0x2d   : > { %s1097_s12 = smov 64   ;;  %s1098_s16 = smov 4  }
  0x2e   : > { %802 = dma.hbm_to_vmem [thread:$0]  (!%p1218_p11), %s1515_s3, 256, %s260_s13, [#allocation6], %s1097_s12, %s1097_s12, %s1098_s16  }
  0x2f   : > { %p42_p1 = scmp.ge.s32.totalorder %s40_s15, 2  ;;  %s49_s19 = sadd.s32 1, %s1082_s26 }
  0x30   : > { %p56_p2 = scmp.ne.s32.totalorder %s1082_s26, %s1078_s25  ;;  %p57_p4 = scmp.eq.s32.totalorder %s1094_s29, 0 }
  0x31   : > { %s1537_s15 = smov (%p42_p1, %s40_s15), 0  ;;  %p1518_p8 = scmp.eq.s32.totalorder %s1188_s30, 1 }
  0x32   : > { %1516 = sst [smem:[#allocation15_spill]] %s1537_s15  ;;  %p1245_p6 = por %p57_p4, %p56_p2 }
  0x33   : > { %p1251_p10 = por %p1518_p8, %p56_p2  ;;  %s44_s14 = ssub.s32 %s1090_s28, %s1537_s15 }
  0x34   : > { %p818_p12 = scmp.lt.s32.totalorder %s1094_s29, 2  ;;  %p47_p11 = scmp.eq.s32.totalorder %s44_s14, 0 }
  0x35   : > { %s276_s13 = sand.u32 1, %s1082_s26   ;;  %s736_s12 = sshll.u32 %s1090_s28, 7 }
  0x36   : > { %s735_s22 = sshll.u32 %s276_s13, 3  ;;  %s1266_s18 = scalar_lea.hbm %s1495_s0, %s736_s12 }
  0x37   : > { %s1260_s23 = scalar_select %p47_p11, %s1082_s26, %s49_s19  }
  0x38   : > { %s280_s8 = scalar_lea.vmem [#allocation2], %s735_s22  ;;  %p1272_p13 = pnand %p818_p12, %p1245_p6 }
  0x39   : > { %s288_s3 = sshll.u32 %s280_s8, 4  ;;  %s277_s19 = scalar_lea.sflag [#allocation3], %s276_s13  ;;  %s1268_s3 = int_to_ptr.vmem [resolvable:$true] %s288_s3 }
  0x3a   : > { %s918_s15 = scalar_lea.hbm %s1266_s18, 128  ;;  %p920_p3 = pneg %p1272_p13 }
  0x3b   : > { %p919_p0 = scmp.ne.s32.totalorder %s1266_s18, %s918_s15  ;;  %s923_s12 = scalar_lea.hbm %s1495_s0, 256 }
  0x3c   : > { %p924_p9 = scmp.lt.u32.totalorder %s1266_s18, %s1495_s0  ;;  %p925_p1 = scmp.lt.u32.totalorder %s923_s12, %s918_s15 }
  0x3d   : > { %p921_p5 = pnand %p920_p3, %p919_p0  ;;  %p927_p4 = scmp.lt.u32.totalorder %s918_s15, %s1266_s18 }
  0x3e   : > { %p926_p2 = por %p925_p1, %p924_p9 }
  0x3f   : > { %p922_p7 = pneg %p921_p5 }
  0x40   : > { %p928_p6 = por %p927_p4, %p926_p2 }
  0x42   : > { %p929_p8 = pnand %p928_p6, %p922_p7 }
  0x44   : > { %932 = shalt.err (!%p929_p8)
}
  0x45   : > { %s933_s13 = scalar_lea.vmem %s1268_s3, 128  ;;  %s1099_s17 = smov [#allocation2]  }
  0x46   : > { %p934_p12 = scmp.ne.s32.totalorder %s1268_s3, %s933_s13  ;;  %s938_s22 = sshll.u32 %s1099_s17, 4  ;;  %s939_s22 = int_to_ptr.vmem [resolvable:$false] %s938_s22 }
  0x47   : > { %s940_s8 = scalar_lea.vmem %s939_s22, 256  ;;  %p941_p5 = scmp.lt.s32.totalorder %s1268_s3, %s939_s22 }
  0x48   : > { %p936_p11 = pnand %p934_p12, %p920_p3  ;;  %p942_p9 = scmp.lt.s32.totalorder %s940_s8, %s933_s13 }
  0x4a   : > { %p937_p0 = pneg %p936_p11  ;;  %p943_p1 = por %p942_p9, %p941_p5 }
  0x4c   : > { %p944_p2 = pnand %p943_p1, %p937_p0 }
  0x4e   : > { %947 = shalt.err (!%p944_p2)
}
  0x4f   : > { %806 = dma.hbm_to_vmem [thread:$0]  (!%p1272_p13), %s1266_s18, 128, %s1268_s3, %s277_s19  }
  0x50   : > { %p1521_p7 = scmp.ne.s32.totalorder %s1513_s11, 0 }
  0x51   : > { %s1304_s15 = sand.u32 (!%p1521_p7), 1, %s1078_s25   ;;  %p1522_p3 = scmp.ne.s32.totalorder (!%p1521_p7), %s1511_s9, 0 }
  0x52   : > { %297 = sbr.rel (%p1521_p7) target bundleno = 816 (0x330), region = 40  ;;  %s738_s12 = sshll.u32 (!%p1521_p7), %s1304_s15, 3 }
  0x53   : > { %s300_s20 = scalar_lea.sflag (!%p1521_p7), [#allocation3], %s1304_s15  ;;  %s303_s16 = scalar_lea.vmem (!%p1521_p7), [#allocation2], %s738_s12 }
  0x59   : > { %1057 = dma.done.wait (%p1522_p3), %s300_s20, 128  }
  0x5a   : > { %1059 = vsyncadd (%p1522_p3), %s300_s20, 4294967168  ;;  %p1523_p4 = scmp.eq.s32.totalorder %s1188_s30, 0 }
  0x5c   : > { %1061 = dma.done.wait (%p1523_p4), [#allocation6], 256   ;;  %p1524_p13 = pmov %p1523_p4 }
  0x5d   : > { %vm352_vm0 = vcmask 261120   ;;  %v349_v0 = vld [vmem:[%s303_s16] sm:$0xff]  ;;  %v886_v7 = vld [vmem:[#allocation5] sm:$0xff]   ;;  %v1100_v8 = vmov 0.0   ;;  %vm1101_vm1 = vmmov 0   ;;  %v887_v9 = vld [vmem:[#allocation5 + $0x8] sm:$0xff]  }
  0x5e   : > { %1063 = vsyncadd (%p1524_p13), [#allocation6], 4294967040  ;;  %v353_v1 = vsel %vm352_vm0, %v349_v0, 0.0  ;;  %779 = vmatprep.subr.bf16.mxu0 %v1100_v8  ;;  %783 = vmatprep.mubr.msk.bf16.mxu0 %vm1101_vm1, %v1100_v8  ;;  %v743_v14 = vld [vmem:[%s1496_s1] ss:$0 sm:$0xff]  ;;  %s1329_s13 = sshll.u32 %s1304_s15, 4 }
  0x5f   : > { %354 = vadd.xlane.f32.xlu0 %v353_v1  ;;  %780 = vmatpush3.bf16.msra.mxu0 %v886_v7  ;;  %v744_v16 = vld [vmem:[%s1497_s2] ss:$0 sm:$0xff]  ;;  %vm450_vm2 = vcmask 60416   ;;  %s1102_s17 = smov 80   ;;  %s1103_s22 = smov 96  }
  0x60   : > { %781 = vmatprep.subr.bf16.mxu0 %v1100_v8  ;;  %v745_v20 = vld [vmem:[%s1499_s4] ss:$0 sm:$0xff]  ;;  %s1332_s8 = scalar_lea.vmem [#allocation7], %s1329_s13  ;;  %s1104_s12 = smov 88  }
  0x61   : > { %s1105_s20 = smov 104   ;;  %s1106_s16 = smov 72  }
  0x62   : > { %s1508_s3 = smov 64   ;;  %s1108_s9 = smov 56  }
  0x63   : > { %782 = vmatpush3.bf16.msra.mxu0 %v887_v9  ;;  %s1109_s11 = smov 48   ;;  %s1110_s18 = smov 120  }
  0x64   : > { %s1111_s14 = smov 112   ;;  %s1112_s19 = smov 40  }
  0xec   : > { %v355_v2 = vpop.xlane.xlu0 %354 }
  0xed   : > { %v357_v3 = vmul.f32 0.03125, %v355_v2 }
  0xef   : > { %v358_v4 = vsub.f32 %v349_v0, %v357_v3 }
  0xf1   : > { %v359_v5 = vmul.f32 %v358_v4, %v358_v4 }
  0xf3   : > { %v360_v6 = vsel %vm352_vm0, %v359_v5, 0.0 }
  0xf4   : > { %361 = vadd.xlane.f32.xlu0 %v360_v6 }
 0x181   : > { %v362_v10 = vpop.xlane.xlu0 %361 }
 0x182   : > { %v363_v11 = vmul.f32 0.03125, %v362_v10 }
 0x184   : > { %v364_v12 = vadd.f32 1e-05, %v363_v11 }
 0x186   : > { %888 = vrsqrt.f32 %v364_v12 }
 0x190   : > { %v889_v13 = vpop.eup %888 }
 0x191   : > { %v366_v15 = vmul.f32 %v889_v13, %v358_v4 }
 0x193   : > { %v373_v17 = vmul.f32 %v743_v14, %v366_v15 }
 0x195   : > { %v380_v18 = vadd.f32 %v744_v16, %v373_v17 }
 0x197   : > { %v381_v19 = vpack.c.bf16 %v380_v18, %v380_v18 }
 0x199   : > { %784 = vmatmul.mubr.msk.bf16.vlgmr.msra.gmra.mrb[0].mxu0 %vm352_vm0, %v381_v19 }
 0x26c   : > { %v442_v21 = vpop.f32.mrb[0].mxu0 }
 0x26d   : > { %v443_v22 = vadd.f32 %v745_v20, %v442_v21  ;;  %v785_v23 = vpop.f32.mrb[1].mxu0 }
 0x26e   : > { %v445_v24 = vpop.f32.mrb[2].mxu0 }
 0x26f   : > { %v448_v25 = vmul.f32 0.35355338, %v443_v22  ;;  %v771_v26 = vpack.c.bf16 %v443_v22, %v443_v22  ;;  %v786_v27 = vpop.f32.mrb[3].mxu0 }
 0x271   : > { %v449_v28 = vpack.c.bf16 %v448_v25, %v448_v25  ;;  %487 = vrot.lane.b32.xlu0 %v771_v26, %s1102_s17  ;;  %456 = vrot.lane.b32.xlu1 %v771_v26, %s1103_s22  ;;  %s340_s17 = scalar_lea.vmem [#allocation8], %s1329_s13 }
 0x272   : > { %s554_s22 = sshll.u32 %s340_s17, 4  ;;  %s1347_s22 = int_to_ptr.vmem [resolvable:$true] %s554_s22 }
 0x273   : > { %451 = vst.msk [vmem:[%s1332_s8] sm:$0xf] %vm450_vm2, %v449_v28 }
 0x275   : > { %472 = vrot.lane.b32.xlu1 %v771_v26, %s1104_s12  ;;  %497 = vrot.lane.b32.xlu0 %v449_v28, %s1105_s20  ;;  %s517_s12 = sand.u32 1, %s1188_s30   ;;  %s1342_s20 = sshll.u32 %s1086_s27, 8 }
 0x276   : > { %s1356_s27 = scalar_lea.sflag [#allocation9], %s517_s12  ;;  %s948_s30 = scalar_lea.vmem %s1347_s22, 256 }
 0x277   : > { %p949_p6 = scmp.ne.s32.totalorder %s1347_s22, %s948_s30 }
 0x279   : > { %502 = vrot.lane.b32.xlu1 %v771_v26, %s1106_s16  ;;  %p950_p8 = pnand %p949_p6, %p1251_p10 }
 0x27b   : > { %p951_p12 = pneg %p950_p8 }
 0x27d   : > { %460 = vrot.lane.b32.xlu1 %v771_v26, %s1508_s3 }
 0x281   : > { %477 = vrot.lane.b32.xlu1 %v771_v26, %s1108_s9 }
 0x285   : > { %492 = vrot.lane.b32.xlu1 %v771_v26, %s1109_s11  ;;  %s1353_s11 = scalar_lea.hbm %s1501_s6, %s1342_s20 }
 0x289   : > { %467 = vrot.lane.b32.xlu1 %v449_v28, %s1110_s18  ;;  %s1113_s18 = smov [#allocation8]  }
 0x28d   : > { %482 = vrot.lane.b32.xlu1 %v449_v28, %s1111_s14  ;;  %s952_s14 = sshll.u32 %s1113_s18, 4  ;;  %s953_s14 = int_to_ptr.vmem [resolvable:$false] %s952_s14 }
 0x28e   : > { %p955_p11 = scmp.lt.s32.totalorder %s1347_s22, %s953_s14 }
 0x291   : > { %507 = vrot.lane.b32.xlu1 %v771_v26, %s1112_s19  ;;  %s954_s19 = scalar_lea.vmem %s953_s14, 512 }
 0x292   : > { %p956_p0 = scmp.lt.s32.totalorder %s954_s19, %s948_s30 }
 0x294   : > { %p957_p5 = por %p956_p0, %p955_p11 }
 0x296   : > { %p958_p9 = pnand %p957_p5, %p951_p12 }
 0x2e3   : > { %v488_v29 = vpop.permute.xlu0 %487  ;;  %v457_v30 = vpop.permute.xlu1 %456 }
 0x2e4   : > { %755 = vst.msk [vmem:[%s340_s17 + $0x8] sm:$0xf] %vm450_vm2, %v488_v29  ;;  %459 = vst.msk [vmem:[%s340_s17] sm:$0xf] %vm450_vm2, %v457_v30 }
 0x2e7   : > { %v473_v31 = vpop.permute.xlu1 %472  ;;  %v498_v32 = vpop.permute.xlu0 %497 }
 0x2e8   : > { %752 = vst.msk [vmem:[%s340_s17 + $0x4] sm:$0xf] %vm450_vm2, %v473_v31  ;;  %757 = vst.msk [vmem:[%s1332_s8 + $0xc] sm:$0xf] %vm450_vm2, %v498_v32 }
 0x2eb   : > { %v503_v33 = vpop.permute.xlu1 %502 }
 0x2ec   : > { %758 = vst.msk [vmem:[%s340_s17 + $0xc] sm:$0xf] %vm450_vm2, %v503_v33 }
 0x2ed   : > { %961 = shalt.err (!%p958_p9)
}
 0x2ee   : > { %s962_s17 = scalar_lea.hbm %s1353_s11, 256  ;;  %s966_s9 = scalar_lea.hbm %s1501_s6, 512 }
 0x2ef   : > { %p963_p1 = scmp.ne.s32.totalorder %s1353_s11, %s962_s17  ;;  %p967_p3 = scmp.lt.u32.totalorder %s1353_s11, %s1501_s6 }
 0x2f0   : > { %p968_p4 = scmp.lt.u32.totalorder %s966_s9, %s962_s17  ;;  %p970_p6 = scmp.lt.u32.totalorder %s962_s17, %s1353_s11 }
 0x2f1   : > { %p964_p2 = pnand %p963_p1, %p1251_p10 }
 0x2f2   : > { %p969_p13 = por %p968_p4, %p967_p3 }
 0x2f3   : > { %p965_p7 = pneg %p964_p2 }
 0x2f4   : > { %p971_p8 = por %p970_p6, %p969_p13 }
 0x2f6   : > { %p972_p12 = pnand %p971_p8, %p965_p7 }
 0x2f8   : > { %975 = shalt.err (!%p972_p12)
}
 0x2f9   : > { %s1114_s30 = smov 4   ;;  %v461_v34 = vpop.permute.xlu1 %460  ;;  %s1384_s19 = scalar_lea.vmem [#allocation10], %s1329_s13 }
 0x2fa   : > { %794 = dma.vmem_to_hbm [thread:$0]  (%p1251_p10), %s1347_s22, 256, %s1353_s11, %s1356_s27, %s1508_s3, %s1508_s3, %s1114_s30  }
 0x2fb   : > { %463 = vst.msk [vmem:[%s1384_s19] sm:$0xf] %vm450_vm2, %v461_v34  ;;  %s537_s17 = sshll.u32 %s1332_s8, 4  ;;  %s1401_s11 = scalar_lea.hbm %s1500_s5, %s1342_s20  ;;  %s1395_s17 = int_to_ptr.vmem [resolvable:$true] %s537_s17 }
 0x2fc   : > { %s513_s16 = scalar_lea.sflag [#allocation4], %s1304_s15  ;;  %s976_s9 = scalar_lea.vmem %s1395_s17, 256 }
 0x2fd   : > { %v478_v35 = vpop.permute.xlu1 %477  ;;  %p977_p11 = scmp.ne.s32.totalorder %s1395_s17, %s976_s9  ;;  %s1115_s18 = smov [#allocation7]  }
 0x2fe   : > { %753 = vst.msk [vmem:[%s1384_s19 + $0x4] sm:$0xf] %vm450_vm2, %v478_v35  ;;  %s980_s14 = sshll.u32 %s1115_s18, 4  ;;  %s981_s14 = int_to_ptr.vmem [resolvable:$false] %s980_s14 }
 0x2ff   : > { %p978_p0 = pnand %p977_p11, %p1251_p10  ;;  %s982_s3 = scalar_lea.vmem %s981_s14, 512 }
 0x300   : > { %p983_p9 = scmp.lt.s32.totalorder %s1395_s17, %s981_s14  ;;  %p984_p1 = scmp.lt.s32.totalorder %s982_s3, %s976_s9 }
 0x301   : > { %v493_v36 = vpop.permute.xlu1 %492  ;;  %p979_p5 = pneg %p978_p0 }
 0x302   : > { %756 = vst.msk [vmem:[%s1384_s19 + $0x8] sm:$0xf] %vm450_vm2, %v493_v36  ;;  %p985_p2 = por %p984_p1, %p983_p9 }
 0x304   : > { %p986_p7 = pnand %p985_p2, %p979_p5 }
 0x305   : > { %v468_v37 = vpop.permute.xlu1 %467 }
 0x306   : > { %751 = vst.msk [vmem:[%s1332_s8 + $0x4] sm:$0xf] %vm450_vm2, %v468_v37 }
 0x309   : > { %v483_v38 = vpop.permute.xlu1 %482 }
 0x30a   : > { %754 = vst.msk [vmem:[%s1332_s8 + $0x8] sm:$0xf] %vm450_vm2, %v483_v38 }
 0x30b   : > { %989 = shalt.err (!%p986_p7)
}
 0x30c   : > { %s990_s8 = scalar_lea.hbm %s1401_s11, 256  ;;  %s994_s18 = scalar_lea.hbm %s1500_s5, 512 }
 0x30d   : > { %p991_p3 = scmp.ne.s32.totalorder %s1401_s11, %s990_s8  ;;  %p995_p6 = scmp.lt.u32.totalorder %s1401_s11, %s1500_s5 }
 0x30e   : > { %p996_p8 = scmp.lt.u32.totalorder %s994_s18, %s990_s8  ;;  %p998_p11 = scmp.lt.u32.totalorder %s990_s8, %s1401_s11 }
 0x30f   : > { %p992_p4 = pnand %p991_p3, %p1251_p10 }
 0x310   : > { %p997_p12 = por %p996_p8, %p995_p6 }
 0x311   : > { %p993_p13 = pneg %p992_p4 }
 0x312   : > { %p999_p0 = por %p998_p11, %p997_p12 }
 0x314   : > { %p1000_p5 = pnand %p999_p0, %p993_p13 }
 0x316   : > { %1003 = shalt.err (!%p1000_p5)
}
 0x317   : > { %s1525_s3 = smov 64   ;;  %s1526_s12 = sshll.u32 %s1384_s19, 4  ;;  %v508_v39 = vpop.permute.xlu1 %507  ;;  %s1435_s12 = int_to_ptr.vmem [resolvable:$true] %s1526_s12 }
 0x318   : > { %793 = dma.vmem_to_hbm [thread:$0]  (%p1251_p10), %s1395_s17, 256, %s1401_s11, %s513_s16, %s1525_s3, %s1525_s3, %s1114_s30  }
 0x319   : > { %s1441_s13 = scalar_lea.hbm %s1502_s7, %s1342_s20  ;;  %759 = vst.msk [vmem:[%s1384_s19 + $0xc] sm:$0xf] %vm450_vm2, %v508_v39  ;;  %s1004_s15 = scalar_lea.vmem %s1435_s12, 256 }
 0x31a   : > { %p1005_p9 = scmp.ne.s32.totalorder %s1435_s12, %s1004_s15  ;;  %s1116_s17 = smov [#allocation10]  }
 0x31b   : > { %s1008_s11 = sshll.u32 %s1116_s17, 4  ;;  %s1009_s11 = int_to_ptr.vmem [resolvable:$false] %s1008_s11 }
 0x31c   : > { %p1006_p1 = pnand %p1005_p9, %p1251_p10  ;;  %s1010_s16 = scalar_lea.vmem %s1009_s11, 512 }
 0x31d   : > { %p1011_p7 = scmp.lt.s32.totalorder %s1435_s12, %s1009_s11  ;;  %p1012_p3 = scmp.lt.s32.totalorder %s1010_s16, %s1004_s15 }
 0x31e   : > { %p1007_p2 = pneg %p1006_p1 }
 0x31f   : > { %p1013_p4 = por %p1012_p3, %p1011_p7 }
 0x321   : > { %p1014_p13 = pnand %p1013_p4, %p1007_p2 }
 0x323   : > { %1017 = shalt.err (!%p1014_p13)
}
 0x324   : > { %s1018_s20 = scalar_lea.hbm %s1441_s13, 256  ;;  %s1022_s18 = scalar_lea.hbm %s1502_s7, 512 }
 0x325   : > { %p1019_p6 = scmp.ne.s32.totalorder %s1441_s13, %s1018_s20  ;;  %p1023_p11 = scmp.lt.u32.totalorder %s1441_s13, %s1502_s7 }
 0x326   : > { %p1024_p0 = scmp.lt.u32.totalorder %s1022_s18, %s1018_s20  ;;  %p1026_p9 = scmp.lt.u32.totalorder %s1018_s20, %s1441_s13 }
 0x327   : > { %p1020_p8 = pnand %p1019_p6, %p1251_p10 }
 0x328   : > { %p1025_p5 = por %p1024_p0, %p1023_p11 }
 0x329   : > { %p1021_p12 = pneg %p1020_p8 }
 0x32a   : > { %p1027_p1 = por %p1026_p9, %p1025_p5 }
 0x32c   : > { %p1028_p2 = pnand %p1027_p1, %p1021_p12 }
 0x32e   : > { %1031 = shalt.err (!%p1028_p2)
}
 0x32f   : > { %795 = dma.vmem_to_hbm [thread:$0]  (%p1251_p10), %s1435_s12, 256, %s1441_s13, %s1356_s27, %s1525_s3, %s1525_s3, %s1114_s30  }
 0x330 PF: > { %s586_s8 = sand.u32 1, %s1074_s24   ;;  %p1527_p7 = scmp.ne.s32.totalorder %s1512_s10, 0 }
 0x331   : > { %p1528_p3 = scmp.ge.s32.totalorder %s1094_s29, 2  ;;  %s587_s15 = scalar_lea.sflag [#allocation4], %s586_s8 }
 0x333   : > { %p808_p4 = pnand %p1528_p3, %p1527_p7 }
 0x335   : > { %1065 = dma.done.wait (!%p808_p4), %s587_s15, 256  }
 0x336   : > { %1067 = vsyncadd (!%p808_p4), %s587_s15, 4294967040  ;;  %s1529_s21 = sadd.s32 4294967294, %s1094_s29  }
 0x337   : > { %s595_s17 = sand.u32 1, %s1529_s21  }
 0x338   : > { %s596_s11 = scalar_lea.sflag [#allocation9], %s595_s17 }
 0x339   : > { %1069 = dma.done.wait (!%p808_p4), %s596_s11, 512  }
 0x33a   : > { %1071 = vsyncadd (!%p808_p4), %s596_s11, 4294966784  ;;  %s28_s29 = sadd.s32 1, %s1094_s29   ;;  %s1530_s30 = sld [smem:[#allocation15_spill]] }
 0x33b   : > { %p25_p10 = scmp.ge.s32.totalorder %s28_s29, 4   ;;  %s1531_s24 = smov %s1078_s25 }
 0x33c   : > { %s1532_s25 = smov %s1082_s26  ;;  %s1533_s26 = smov %s1260_s23 }
 0x33d   : > { %s1534_s27 = smov %s1090_s28  ;;  %27 = sbr.rel (!%p25_p10) target bundleno = 11 (0xb), region = 130 }
 0x340   : > { %s1535_s28 = smov %s1530_s30 }
 0x344   :  { %610 = vsyncpa [#allocation3], 1 }
 0x345   :  { %612 = vsyncpa [#allocation3 + $0x1], 1 }
 0x346   :  { %613 = vsyncpa [#allocation6], 1 }
 0x347   :  { %614 = vsyncpa [#allocation4], 1 }
 0x348   :  { %616 = vsyncpa [#allocation4 + $0x1], 1 }
 0x349   :  { %617 = vsyncpa [#allocation9], 1 }
 0x34a   :  { %619 = vsyncpa [#allocation9 + $0x1], 1 }

</bundles_post_ra>
